<compile_context>
chip_gen: v5e
topology: v5e:2x2
jax: 0.10.0
libtpu: 0.0.40
codegen_flags: <defaults>
</compile_context>

<pallas_src>
import jax
import jax.numpy as jnp
from jax.experimental import pallas as pl
from jax.experimental.pallas import tpu as pltpu


def _make_kernel(*, has_bias, has_mask, attn_bias_type, num_heads, head_dim,
                 compute_dtype):
    D = head_dim

    def kernel(*refs):
        it = iter(refs)
        xq_ref = next(it)      # (1, TQ, F) compute_dtype  (query rows)
        xkv_ref = next(it)     # (1, N, F)  compute_dtype  (key/value rows)
        wq_ref = next(it)      # (F, F)     compute_dtype  (scaling folded in)
        wk_ref = next(it)      # (F, F)
        wv_ref = next(it)      # (F, F)
        bq_ref = next(it)      # (1, F)     f32            (scaling folded in)
        bk_ref = next(it)      # (1, F)     f32
        bv_ref = next(it)      # (1, F)     f32
        wo_ref = next(it)      # (1, D, F)  compute_dtype  (per-head rows of Wo)
        bo_ref = next(it)      # (1, F)     f32
        bias_ref = next(it) if has_bias else None   # (1, 1, TQ, N) compute_dtype
        mask_ref = next(it) if has_mask else None   # (1, TQ, N)    bf16 additive
        o_ref = next(it)       # (1, TQ, F)
        q_sc = next(it)        # (H, TQ, D) compute_dtype scratch (head-major)
        k_sc = next(it)        # (H, N, D)
        v_sc = next(it)        # (H, N, D)
        acc_ref = next(it)     # (TQ, F)    f32 scratch, resident across heads

        h = pl.program_id(2)

        @pl.when(h == 0)
        def _init():
            acc_ref[...] = jnp.zeros_like(acc_ref)
            # Hoisted full-width Q/K/V projections: one (rows, F) @ (F, F) MXU call
            # each per (batch, query-tile), bf16 operands, f32 accumulation.
            xq = xq_ref[0]
            xkv = xkv_ref[0]
            qf = jnp.dot(xq, wq_ref[...], preferred_element_type=jnp.float32) + bq_ref[...]
            kf = jnp.dot(xkv, wk_ref[...], preferred_element_type=jnp.float32) + bk_ref[...]
            vf = jnp.dot(xkv, wv_ref[...], preferred_element_type=jnp.float32) + bv_ref[...]
            # Split into head-major scratch once per query tile (static lane slices)
            # so every per-head grid step only indexes the leading dim.
            for hh in range(num_heads):
                sl = slice(hh * D, (hh + 1) * D)
                q_sc[hh] = qf[:, sl].astype(compute_dtype)
                k_sc[hh] = kf[:, sl].astype(compute_dtype)
                v_sc[hh] = vf[:, sl].astype(compute_dtype)

        q = q_sc[h]            # (TQ, D)
        k = k_sc[h]            # (N, D)
        v = v_sc[h]            # (N, D)

        # scores (TQ, N) = q @ k^T, bf16 operands on the MXU, f32 accumulation.
        s = jax.lax.dot_general(q, k, (((1,), (1,)), ((), ())),
                                preferred_element_type=jnp.float32)
        # Elementwise score math stays f32 (v5e has no bf16 VPU/EUP).
        if has_bias:
            b = bias_ref[0, 0].astype(jnp.float32)
            s = s + b if attn_bias_type == "add" else s * b
        if has_mask:
            # Additive mask: 0 where valid, -1e30 where masked.  Finite (not -inf),
            # so no NaNs can arise; this relies on the host-side "unmask key column
            # 0" step (matching the PyTorch forward) so no row is fully masked.
            s = s + mask_ref[0].astype(jnp.float32)

        # Softmax over keys in f32.  Normalization is deferred onto the (TQ, D)
        # PV result and is an exact divide (no approximate reciprocal).
        s = s - jnp.max(s, axis=-1, keepdims=True)
        p = jnp.exp(s)
        l = jnp.sum(p, axis=-1, keepdims=True)                 # (TQ, 1), >= 1

        attn = jnp.dot(p.astype(compute_dtype), v,
                       preferred_element_type=jnp.float32)      # (TQ, D)
        attn = attn / l                                         # deferred, exact
        # Fused per-head output projection accumulated over heads in f32.
        acc_ref[...] += jnp.dot(attn.astype(compute_dtype), wo_ref[0],
                                preferred_element_type=jnp.float32)   # (TQ, F)

        @pl.when(h == num_heads - 1)
        def _finalize():
            o_ref[0] = (acc_ref[...] + bo_ref[...]).astype(o_ref.dtype)

    return kernel


def _vmem_budget_cap():
    """~0.65x of physical per-core VMEM (generation dependent), safe fallback."""
    try:
        cap = getattr(pltpu.get_tpu_info(), "vmem_capacity_bytes", None)
        if cap:
            return int(0.65 * cap)
    except Exception:
        pass
    return 40 << 20  # ~0.65 * 64 MiB: conservative (v7x-sized) fallback


def _pick_query_tile(n, batch):
    """Query-tile rows.  Only tile when B == 1 so both v7x TensorCores get work."""
    if batch > 1 or n < 32 or n % 16 != 0:
        return n
    for cand in range(n // 2, 15, -1):
        if n % cand == 0 and cand % 16 == 0:
            return cand
    return n


def biased_mha_pallas(ndata, params, attn_bias=None, attn_mask=None, *,
                      num_heads, attn_bias_type="add",
                      compute_dtype=jnp.bfloat16, bias_buffer_count=None):
    """Pallas forward pass equivalent to BiasedMHA.forward (eval mode).

    compute_dtype: dtype of the MXU operands / streamed activations, weights and
        bias (accumulation is always f32).  bfloat16 by default per the perf
        review; pass jnp.float32 for a near-exact (slower) path.
    bias_buffer_count: optional pipeline depth for the attn_bias stream (the only
        per-grid-step N^2 DMA).  None keeps the default double-buffering.
    """
    B, N, F = ndata.shape
    assert F % num_heads == 0, "feat_size must be divisible by num_heads"
    assert attn_bias_type in ("add", "mul")
    H = num_heads
    D = F // H
    scaling = D ** (-0.5)

    wq, bq, wk, bk, wv, bv, wo, bo = params

    # compute_dtype (bf16) MXU operands / HBM streams; scaling folded into Wq, bq.
    x_c = ndata.astype(compute_dtype)
    wq_c = (wq * jnp.float32(scaling)).astype(compute_dtype)
    wk_c = wk.astype(compute_dtype)
    wv_c = wv.astype(compute_dtype)
    wo_h = wo.reshape(H, D, F).astype(compute_dtype)        # per-head rows of Wo
    bq_2 = (bq * jnp.float32(scaling)).reshape(1, F).astype(jnp.float32)
    bk_2 = bk.reshape(1, F).astype(jnp.float32)
    bv_2 = bv.reshape(1, F).astype(jnp.float32)
    bo_2 = bo.reshape(1, F).astype(jnp.float32)

    has_bias = attn_bias is not None
    has_mask = attn_mask is not None

    tq = _pick_query_tile(N, B)
    nq = N // tq

    inputs = [x_c, x_c, wq_c, wk_c, wv_c, bq_2, bk_2, bv_2, wo_h, bo_2]
    in_specs = [
        pl.BlockSpec((1, tq, F), lambda b, qi, h: (b, qi, 0)),   # x: query rows
        pl.BlockSpec((1, N, F), lambda b, qi, h: (b, 0, 0)),     # x: key/value rows
        pl.BlockSpec((F, F), lambda b, qi, h: (0, 0)),           # Wq (scaled)
        pl.BlockSpec((F, F), lambda b, qi, h: (0, 0)),           # Wk
        pl.BlockSpec((F, F), lambda b, qi, h: (0, 0)),           # Wv
        pl.BlockSpec((1, F), lambda b, qi, h: (0, 0)),           # bq (scaled)
        pl.BlockSpec((1, F), lambda b, qi, h: (0, 0)),           # bk
        pl.BlockSpec((1, F), lambda b, qi, h: (0, 0)),           # bv
        pl.BlockSpec((1, D, F), lambda b, qi, h: (h, 0, 0)),     # Wo rows, head h
        pl.BlockSpec((1, F), lambda b, qi, h: (0, 0)),           # bo
    ]

    if has_bias:
        # Streamed in compute_dtype (bf16): halves the dominant N^2 HBM stream.
        bias_t = jnp.transpose(attn_bias, (0, 3, 1, 2)).astype(compute_dtype)  # (B,H,N,N)
        inputs.append(bias_t)
        bias_kwargs = {}
        if bias_buffer_count is not None:
            bias_kwargs["pipeline_mode"] = pl.Buffered(bias_buffer_count)
        in_specs.append(
            pl.BlockSpec((1, 1, tq, N), lambda b, qi, h: (b, h, qi, 0), **bias_kwargs))
    if has_mask:
        m = attn_mask.astype(bool)
        # The PyTorch forward unmasks key column 0 for every query row.  This also
        # guarantees no fully-masked row, so the finite -1e30 additive mask can
        # never produce NaNs.  Do not remove.
        m = m.at[:, :, 0].set(False)
        mask_add = jnp.where(m, jnp.float32(-1e30), jnp.float32(0.0)).astype(jnp.bfloat16)
        inputs.append(mask_add)
        in_specs.append(pl.BlockSpec((1, tq, N), lambda b, qi, h: (b, qi, 0)))

    kernel = _make_kernel(has_bias=has_bias, has_mask=has_mask,
                          attn_bias_type=attn_bias_type, num_heads=H,
                          head_dim=D, compute_dtype=compute_dtype)

    # Per-generation VMEM budget (no fixed 48 MiB clamp; ~0.65x physical cap).
    cds = jnp.dtype(compute_dtype).itemsize
    dp = -(-D // 128) * 128                       # lane-padded head dim (scratch)
    est = 2 * (tq * F + N * F) * cds              # x blocks (double-buffered)
    est += 3 * F * F * cds                        # resident full-width weights
    est += 2 * D * F * cds                        # per-head Wo (double-buffered)
    est += 2 * tq * F * ndata.dtype.itemsize      # output block
    est += H * (tq + 2 * N) * dp * cds            # head-major q/k/v scratch
    est += tq * F * 4                             # f32 accumulator
    est += 4 * tq * N * 4                         # score / prob temporaries
    if has_bias:
        est += (bias_buffer_count or 2) * tq * N * cds
    if has_mask:
        est += 2 * tq * N * 2
    vmem_limit = int(min(_vmem_budget_cap(), max(2 * est, 32 << 20)))

    return pl.pallas_call(
        kernel,
        out_shape=jax.ShapeDtypeStruct((B, N, F), ndata.dtype),
        grid_spec=pltpu.PrefetchScalarGridSpec(
            num_scalar_prefetch=0,
            grid=(B, nq, H),
            in_specs=in_specs,
            out_specs=pl.BlockSpec((1, tq, F), lambda b, qi, h: (b, qi, 0)),
            scratch_shapes=[
                pltpu.VMEM((H, tq, D), compute_dtype),   # q, head-major
                pltpu.VMEM((H, N, D), compute_dtype),    # k
                pltpu.VMEM((H, N, D), compute_dtype),    # v
                pltpu.VMEM((tq, F), jnp.float32),        # output accumulator
            ],
        ),
        compiler_params=pltpu.CompilerParams(
            dimension_semantics=("parallel", "parallel", "arbitrary"),
            vmem_limit_bytes=vmem_limit,
        ),
    )(*inputs)


def biased_mha_reference(ndata, params, attn_bias, attn_mask,
                         *, num_heads, attn_bias_type="add"):
    """Pure-JAX mirror of the PyTorch forward pass (eval mode)."""
    B, N, F = ndata.shape
    D = F // num_heads
    scaling = D ** (-0.5)
    wq, bq, wk, bk, wv, bv, wo, bo = params

    q = (ndata @ wq + bq).reshape(B, N, num_heads, D) * scaling
    k = (ndata @ wk + bk).reshape(B, N, num_heads, D)
    v = (ndata @ wv + bv).reshape(B, N, num_heads, D)

    s = jnp.einsum("bnhd,bmhd->bhnm", q, k)
    if attn_bias is not None:
        b_t = jnp.transpose(attn_bias, (0, 3, 1, 2))
        s = s + b_t if attn_bias_type == "add" else s * b_t
    if attn_mask is not None:
        m = attn_mask.astype(bool).at[:, :, 0].set(False)
        s = jnp.where(m[:, None, :, :], -jnp.inf, s)
    p = jax.nn.softmax(s, axis=-1)
    o = jnp.einsum("bhnm,bmhd->bnhd", p, v).reshape(B, N, F)
    return o @ wo + bo


if __name__ == "__main__":
    F, H = 32, 4

    def make_params(key, feat):
        ks = jax.random.split(key, 7)

        def xavier(k, gain):
            bound = gain * (6.0 / (feat + feat)) ** 0.5
            return jax.random.uniform(k, (feat, feat), jnp.float32, -bound, bound)

        gain_qkv = 2.0 ** (-0.5)
        wq = xavier(ks[0], gain_qkv)
        wk = xavier(ks[1], gain_qkv)
        wv = xavier(ks[2], gain_qkv)
        wo = xavier(ks[3], 1.0)
        b_bound = 1.0 / (feat ** 0.5)
        bq = jax.random.uniform(ks[4], (feat,), jnp.float32, -b_bound, b_bound)
        bk = jax.random.uniform(ks[5], (feat,), jnp.float32, -b_bound, b_bound)
        bv = jax.random.uniform(ks[6], (feat,), jnp.float32, -b_bound, b_bound)
        bo = jnp.zeros((feat,), jnp.float32)     # out_proj bias initialized to 0
        return (wq, bq, wk, bk, wv, bv, wo, bo)

    key = jax.random.PRNGKey(0)
    kp, kx, kb, km, kx1, kb1, km1 = jax.random.split(key, 7)
    params = make_params(kp, F)

    # Case A shapes: B=2, N=8 (single query tile).
    B, N = 2, 8
    ndata = jax.random.normal(kx, (B, N, F), jnp.float32)
    attn_bias = 0.1 * jax.random.normal(kb, (B, N, N, H), jnp.float32)
    attn_mask = jax.random.bernoulli(km, 0.2, (B, N, N))

    # Tolerances: the default path deliberately uses bf16 MXU operands (per the
    # perf review), so compare at bf16-level accuracy; the f32 path is tighter.
    TOL_BF16 = dict(atol=2e-2, rtol=2e-2)
    TOL_F32 = dict(atol=5e-3, rtol=5e-3)

    with jax.default_matmul_precision("float32"):
        y_ref = biased_mha_reference(ndata, params, attn_bias, attn_mask,
                                     num_heads=H, attn_bias_type="add")
        y_mul_ref = biased_mha_reference(ndata, params, attn_bias, attn_mask,
                                         num_heads=H, attn_bias_type="mul")
        y_plain_ref = biased_mha_reference(ndata, params, None, None, num_heads=H)

    outs = []

    # 1) additive bias + mask (default bf16 MXU path)
    y = biased_mha_pallas(ndata, params, attn_bias, attn_mask,
                          num_heads=H, attn_bias_type="add")
    assert y.shape == (B, N, F)
    assert jnp.allclose(y, y_ref, **TOL_BF16), "mismatch vs reference (add, bias+mask)"
    outs.append(y)

    # 2) multiplicative bias + mask
    y_mul = biased_mha_pallas(ndata, params, attn_bias, attn_mask,
                              num_heads=H, attn_bias_type="mul")
    assert jnp.allclose(y_mul, y_mul_ref, **TOL_BF16), "mismatch vs reference (mul)"
    outs.append(y_mul)

    # 3) specialized no-bias / no-mask path (inputs omitted at compile time)
    y_plain = biased_mha_pallas(ndata, params, None, None, num_heads=H)
    assert jnp.allclose(y_plain, y_plain_ref, **TOL_BF16), "mismatch vs reference (plain)"
    outs.append(y_plain)

    # 4) f32 MXU-operand path ('mul', the previously failing case) at tighter tol
    y_f32 = biased_mha_pallas(ndata, params, attn_bias, attn_mask,
                              num_heads=H, attn_bias_type="mul",
                              compute_dtype=jnp.float32)
    assert jnp.allclose(y_f32, y_mul_ref, **TOL_F32), "mismatch vs reference (mul, f32 path)"
    outs.append(y_f32)

    # 5) B == 1 with query tiling (keeps both v7x TensorCores busy)
    B1, N1 = 1, 32
    ndata1 = jax.random.normal(kx1, (B1, N1, F), jnp.float32)
    attn_bias1 = 0.1 * jax.random.normal(kb1, (B1, N1, N1, H), jnp.float32)
    attn_mask1 = jax.random.bernoulli(km1, 0.2, (B1, N1, N1))
    with jax.default_matmul_precision("float32"):
        y1_ref = biased_mha_reference(ndata1, params, attn_bias1, attn_mask1,
                                      num_heads=H, attn_bias_type="add")
    y1 = biased_mha_pallas(ndata1, params, attn_bias1, attn_mask1,
                           num_heads=H, attn_bias_type="add")
    assert y1.shape == (B1, N1, F)
    assert jnp.allclose(y1, y1_ref, **TOL_BF16), "mismatch vs reference (B=1, query-tiled)"
    outs.append(y1)

    jax.block_until_ready(outs)
    print("KERNEL_OK")
</pallas_src>

<mosaic_0001>
module attributes {stable_mosaic.version = 11 : i64} {
  func.func @kernel(%arg0: i32, %arg1: i32, %arg2: i32, %arg3: memref<1x8x32xbf16, #tpu.memory_space<vmem>>, %arg4: memref<1x8x32xbf16, #tpu.memory_space<vmem>>, %arg5: memref<32x32xbf16, #tpu.memory_space<vmem>>, %arg6: memref<32x32xbf16, #tpu.memory_space<vmem>>, %arg7: memref<32x32xbf16, #tpu.memory_space<vmem>>, %arg8: memref<1x32xf32, #tpu.memory_space<vmem>>, %arg9: memref<1x32xf32, #tpu.memory_space<vmem>>, %arg10: memref<1x32xf32, #tpu.memory_space<vmem>>, %arg11: memref<1x8x32xbf16, #tpu.memory_space<vmem>>, %arg12: memref<1x32xf32, #tpu.memory_space<vmem>>, %arg13: memref<1x1x8x8xbf16, #tpu.memory_space<vmem>>, %arg14: memref<1x8x8xbf16, #tpu.memory_space<vmem>>, %arg15: memref<1x8x32xf32, #tpu.memory_space<vmem>>, %arg16: memref<4x8x8xbf16, #tpu.memory_space<vmem>>, %arg17: memref<4x8x8xbf16, #tpu.memory_space<vmem>>, %arg18: memref<4x8x8xbf16, #tpu.memory_space<vmem>>, %arg19: memref<8x32xf32, #tpu.memory_space<vmem>>) attributes {dimension_semantics = [#tpu.dimension_semantics<parallel>, #tpu.dimension_semantics<parallel>, #tpu.dimension_semantics<arbitrary>], iteration_bounds = array<i64: 2, 1, 4>, scalar_prefetch = 0 : i64, scratch_operands = 4 : i64, tpu.core_type = #tpu.core_type<tc>, window_params = [{transform_indices = @transform_0, window_bounds = array<i64: 1, 8, 32>}, {transform_indices = @transform_1, window_bounds = array<i64: 1, 8, 32>}, {pipeline_mode = #tpu.pipeline_mode<synchronous>, transform_indices = @transform_2, window_bounds = array<i64: 32, 32>}, {pipeline_mode = #tpu.pipeline_mode<synchronous>, transform_indices = @transform_3, window_bounds = array<i64: 32, 32>}, {pipeline_mode = #tpu.pipeline_mode<synchronous>, transform_indices = @transform_4, window_bounds = array<i64: 32, 32>}, {pipeline_mode = #tpu.pipeline_mode<synchronous>, transform_indices = @transform_5, window_bounds = array<i64: 1, 32>}, {pipeline_mode = #tpu.pipeline_mode<synchronous>, transform_indices = @transform_6, window_bounds = array<i64: 1, 32>}, {pipeline_mode = #tpu.pipeline_mode<synchronous>, transform_indices = @transform_7, window_bounds = array<i64: 1, 32>}, {transform_indices = @transform_8, window_bounds = array<i64: 1, 8, 32>}, {pipeline_mode = #tpu.pipeline_mode<synchronous>, transform_indices = @transform_9, window_bounds = array<i64: 1, 32>}, {transform_indices = @transform_10, window_bounds = array<i64: 1, 1, 8, 8>}, {transform_indices = @transform_11, window_bounds = array<i64: 1, 8, 8>}, {transform_indices = @transform_12, window_bounds = array<i64: 1, 8, 32>}]} {
    %c0_i32 = arith.constant 0 : i32
    %0 = arith.cmpi eq, %arg2, %c0_i32 : i32
    %1 = arith.extui %0 : i1 to i32
    %c0_i32_0 = arith.constant 0 : i32
    %2 = arith.cmpi ne, %1, %c0_i32_0 : i32
    scf.if %2 {
      %cst_25 = arith.constant 0.000000e+00 : f32
      %42 = vector.broadcast %cst_25 : f32 to vector<8x32xf32>
      %c0_26 = arith.constant 0 : index
      %c0_27 = arith.constant 0 : index
      %43 = vector.load %arg19[%c0_26, %c0_27] : memref<8x32xf32, #tpu.memory_space<vmem>>, vector<8x32xf32>
      tpu.vector_store %arg19[%c0_26, %c0_27], %42 {strides = array<i32>} : memref<8x32xf32, #tpu.memory_space<vmem>>, vector<8x32xf32>,
      %c0_28 = arith.constant 0 : index
      %c0_29 = arith.constant 0 : index
      %c0_30 = arith.constant 0 : index
      %44 = vector.load %arg3[%c0_28, %c0_29, %c0_30] : memref<1x8x32xbf16, #tpu.memory_space<vmem>>, vector<1x8x32xbf16>
      %45 = vector.shape_cast %44 : vector<1x8x32xbf16> to vector<8x32xbf16>
      %c0_31 = arith.constant 0 : index
      %c0_32 = arith.constant 0 : index
      %c0_33 = arith.constant 0 : index
      %46 = vector.load %arg4[%c0_31, %c0_32, %c0_33] : memref<1x8x32xbf16, #tpu.memory_space<vmem>>, vector<1x8x32xbf16>
      %47 = vector.shape_cast %46 : vector<1x8x32xbf16> to vector<8x32xbf16>
      %c0_34 = arith.constant 0 : index
      %c0_35 = arith.constant 0 : index
      %48 = vector.load %arg5[%c0_34, %c0_35] : memref<32x32xbf16, #tpu.memory_space<vmem>>, vector<32x32xbf16>
      %cst_36 = arith.constant dense<0.000000e+00> : vector<8x32xf32>
      %49 = tpu.matmul %45, %48, %cst_36 {dimension_numbers = #tpu.dot_dimension_numbers<[1], [0], [0], [1], [0, 0, 1, 1], [], []>} : vector<8x32xbf16>, vector<32x32xbf16>, vector<8x32xf32> -> vector<8x32xf32>
      %c0_37 = arith.constant 0 : index
      %c0_38 = arith.constant 0 : index
      %50 = vector.load %arg8[%c0_37, %c0_38] : memref<1x32xf32, #tpu.memory_space<vmem>>, vector<1x32xf32>
      %51 = vector.broadcast %50 : vector<1x32xf32> to vector<8x32xf32>
      %52 = arith.addf %49, %51 : vector<8x32xf32>
      %c0_39 = arith.constant 0 : index
      %c0_40 = arith.constant 0 : index
      %53 = vector.load %arg6[%c0_39, %c0_40] : memref<32x32xbf16, #tpu.memory_space<vmem>>, vector<32x32xbf16>
      %cst_41 = arith.constant dense<0.000000e+00> : vector<8x32xf32>
      %54 = tpu.matmul %47, %53, %cst_41 {dimension_numbers = #tpu.dot_dimension_numbers<[1], [0], [0], [1], [0, 0, 1, 1], [], []>} : vector<8x32xbf16>, vector<32x32xbf16>, vector<8x32xf32> -> vector<8x32xf32>
      %c0_42 = arith.constant 0 : index
      %c0_43 = arith.constant 0 : index
      %55 = vector.load %arg9[%c0_42, %c0_43] : memref<1x32xf32, #tpu.memory_space<vmem>>, vector<1x32xf32>
      %56 = vector.broadcast %55 : vector<1x32xf32> to vector<8x32xf32>
      %57 = arith.addf %54, %56 : vector<8x32xf32>
      %c0_44 = arith.constant 0 : index
      %c0_45 = arith.constant 0 : index
      %58 = vector.load %arg7[%c0_44, %c0_45] : memref<32x32xbf16, #tpu.memory_space<vmem>>, vector<32x32xbf16>
      %cst_46 = arith.constant dense<0.000000e+00> : vector<8x32xf32>
      %59 = tpu.matmul %47, %58, %cst_46 {dimension_numbers = #tpu.dot_dimension_numbers<[1], [0], [0], [1], [0, 0, 1, 1], [], []>} : vector<8x32xbf16>, vector<32x32xbf16>, vector<8x32xf32> -> vector<8x32xf32>
      %c0_47 = arith.constant 0 : index
      %c0_48 = arith.constant 0 : index
      %60 = vector.load %arg10[%c0_47, %c0_48] : memref<1x32xf32, #tpu.memory_space<vmem>>, vector<1x32xf32>
      %61 = vector.broadcast %60 : vector<1x32xf32> to vector<8x32xf32>
      %62 = arith.addf %59, %61 : vector<8x32xf32>
      %63 = vector.extract_strided_slice %52 {offsets = [0, 0], sizes = [8, 8], strides = [1, 1]} : vector<8x32xf32> to vector<8x8xf32>
      %64 = arith.truncf %63 : vector<8x8xf32> to vector<8x8xbf16>
      %c0_49 = arith.constant 0 : index
      %c0_50 = arith.constant 0 : index
      %c0_51 = arith.constant 0 : index
      %65 = vector.load %arg16[%c0_49, %c0_50, %c0_51] : memref<4x8x8xbf16, #tpu.memory_space<vmem>>, vector<1x8x8xbf16>
      %66 = vector.shape_cast %65 : vector<1x8x8xbf16> to vector<8x8xbf16>
      %67 = vector.shape_cast %64 : vector<8x8xbf16> to vector<1x8x8xbf16>
      tpu.vector_store %arg16[%c0_49, %c0_50, %c0_51], %67 {strides = array<i32>} : memref<4x8x8xbf16, #tpu.memory_space<vmem>>, vector<1x8x8xbf16>,
      %68 = vector.extract_strided_slice %57 {offsets = [0, 0], sizes = [8, 8], strides = [1, 1]} : vector<8x32xf32> to vector<8x8xf32>
      %69 = arith.truncf %68 : vector<8x8xf32> to vector<8x8xbf16>
      %c0_52 = arith.constant 0 : index
      %c0_53 = arith.constant 0 : index
      %c0_54 = arith.constant 0 : index
      %70 = vector.load %arg17[%c0_52, %c0_53, %c0_54] : memref<4x8x8xbf16, #tpu.memory_space<vmem>>, vector<1x8x8xbf16>
      %71 = vector.shape_cast %70 : vector<1x8x8xbf16> to vector<8x8xbf16>
      %72 = vector.shape_cast %69 : vector<8x8xbf16> to vector<1x8x8xbf16>
      tpu.vector_store %arg17[%c0_52, %c0_53, %c0_54], %72 {strides = array<i32>} : memref<4x8x8xbf16, #tpu.memory_space<vmem>>, vector<1x8x8xbf16>,
      %73 = vector.extract_strided_slice %62 {offsets = [0, 0], sizes = [8, 8], strides = [1, 1]} : vector<8x32xf32> to vector<8x8xf32>
      %74 = arith.truncf %73 : vector<8x8xf32> to vector<8x8xbf16>
      %c0_55 = arith.constant 0 : index
      %c0_56 = arith.constant 0 : index
      %c0_57 = arith.constant 0 : index
      %75 = vector.load %arg18[%c0_55, %c0_56, %c0_57] : memref<4x8x8xbf16, #tpu.memory_space<vmem>>, vector<1x8x8xbf16>
      %76 = vector.shape_cast %75 : vector<1x8x8xbf16> to vector<8x8xbf16>
      %77 = vector.shape_cast %74 : vector<8x8xbf16> to vector<1x8x8xbf16>
      tpu.vector_store %arg18[%c0_55, %c0_56, %c0_57], %77 {strides = array<i32>} : memref<4x8x8xbf16, #tpu.memory_space<vmem>>, vector<1x8x8xbf16>,
      %78 = vector.extract_strided_slice %52 {offsets = [0, 8], sizes = [8, 8], strides = [1, 1]} : vector<8x32xf32> to vector<8x8xf32>
      %79 = arith.truncf %78 : vector<8x8xf32> to vector<8x8xbf16>
      %c1 = arith.constant 1 : index
      %c0_58 = arith.constant 0 : index
      %c0_59 = arith.constant 0 : index
      %80 = vector.load %arg16[%c1, %c0_58, %c0_59] : memref<4x8x8xbf16, #tpu.memory_space<vmem>>, vector<1x8x8xbf16>
      %81 = vector.shape_cast %80 : vector<1x8x8xbf16> to vector<8x8xbf16>
      %82 = vector.shape_cast %79 : vector<8x8xbf16> to vector<1x8x8xbf16>
      tpu.vector_store %arg16[%c1, %c0_58, %c0_59], %82 {strides = array<i32>} : memref<4x8x8xbf16, #tpu.memory_space<vmem>>, vector<1x8x8xbf16>,
      %83 = vector.extract_strided_slice %57 {offsets = [0, 8], sizes = [8, 8], strides = [1, 1]} : vector<8x32xf32> to vector<8x8xf32>
      %84 = arith.truncf %83 : vector<8x8xf32> to vector<8x8xbf16>
      %c1_60 = arith.constant 1 : index
      %c0_61 = arith.constant 0 : index
      %c0_62 = arith.constant 0 : index
      %85 = vector.load %arg17[%c1_60, %c0_61, %c0_62] : memref<4x8x8xbf16, #tpu.memory_space<vmem>>, vector<1x8x8xbf16>
      %86 = vector.shape_cast %85 : vector<1x8x8xbf16> to vector<8x8xbf16>
      %87 = vector.shape_cast %84 : vector<8x8xbf16> to vector<1x8x8xbf16>
      tpu.vector_store %arg17[%c1_60, %c0_61, %c0_62], %87 {strides = array<i32>} : memref<4x8x8xbf16, #tpu.memory_space<vmem>>, vector<1x8x8xbf16>,
      %88 = vector.extract_strided_slice %62 {offsets = [0, 8], sizes = [8, 8], strides = [1, 1]} : vector<8x32xf32> to vector<8x8xf32>
      %89 = arith.truncf %88 : vector<8x8xf32> to vector<8x8xbf16>
      %c1_63 = arith.constant 1 : index
      %c0_64 = arith.constant 0 : index
      %c0_65 = arith.constant 0 : index
      %90 = vector.load %arg18[%c1_63, %c0_64, %c0_65] : memref<4x8x8xbf16, #tpu.memory_space<vmem>>, vector<1x8x8xbf16>
      %91 = vector.shape_cast %90 : vector<1x8x8xbf16> to vector<8x8xbf16>
      %92 = vector.shape_cast %89 : vector<8x8xbf16> to vector<1x8x8xbf16>
      tpu.vector_store %arg18[%c1_63, %c0_64, %c0_65], %92 {strides = array<i32>} : memref<4x8x8xbf16, #tpu.memory_space<vmem>>, vector<1x8x8xbf16>,
      %93 = vector.extract_strided_slice %52 {offsets = [0, 16], sizes = [8, 8], strides = [1, 1]} : vector<8x32xf32> to vector<8x8xf32>
      %94 = arith.truncf %93 : vector<8x8xf32> to vector<8x8xbf16>
      %c2 = arith.constant 2 : index
      %c0_66 = arith.constant 0 : index
      %c0_67 = arith.constant 0 : index
      %95 = vector.load %arg16[%c2, %c0_66, %c0_67] : memref<4x8x8xbf16, #tpu.memory_space<vmem>>, vector<1x8x8xbf16>
      %96 = vector.shape_cast %95 : vector<1x8x8xbf16> to vector<8x8xbf16>
      %97 = vector.shape_cast %94 : vector<8x8xbf16> to vector<1x8x8xbf16>
      tpu.vector_store %arg16[%c2, %c0_66, %c0_67], %97 {strides = array<i32>} : memref<4x8x8xbf16, #tpu.memory_space<vmem>>, vector<1x8x8xbf16>,
      %98 = vector.extract_strided_slice %57 {offsets = [0, 16], sizes = [8, 8], strides = [1, 1]} : vector<8x32xf32> to vector<8x8xf32>
      %99 = arith.truncf %98 : vector<8x8xf32> to vector<8x8xbf16>
      %c2_68 = arith.constant 2 : index
      %c0_69 = arith.constant 0 : index
      %c0_70 = arith.constant 0 : index
      %100 = vector.load %arg17[%c2_68, %c0_69, %c0_70] : memref<4x8x8xbf16, #tpu.memory_space<vmem>>, vector<1x8x8xbf16>
      %101 = vector.shape_cast %100 : vector<1x8x8xbf16> to vector<8x8xbf16>
      %102 = vector.shape_cast %99 : vector<8x8xbf16> to vector<1x8x8xbf16>
      tpu.vector_store %arg17[%c2_68, %c0_69, %c0_70], %102 {strides = array<i32>} : memref<4x8x8xbf16, #tpu.memory_space<vmem>>, vector<1x8x8xbf16>,
      %103 = vector.extract_strided_slice %62 {offsets = [0, 16], sizes = [8, 8], strides = [1, 1]} : vector<8x32xf32> to vector<8x8xf32>
      %104 = arith.truncf %103 : vector<8x8xf32> to vector<8x8xbf16>
      %c2_71 = arith.constant 2 : index
      %c0_72 = arith.constant 0 : index
      %c0_73 = arith.constant 0 : index
      %105 = vector.load %arg18[%c2_71, %c0_72, %c0_73] : memref<4x8x8xbf16, #tpu.memory_space<vmem>>, vector<1x8x8xbf16>
      %106 = vector.shape_cast %105 : vector<1x8x8xbf16> to vector<8x8xbf16>
      %107 = vector.shape_cast %104 : vector<8x8xbf16> to vector<1x8x8xbf16>
      tpu.vector_store %arg18[%c2_71, %c0_72, %c0_73], %107 {strides = array<i32>} : memref<4x8x8xbf16, #tpu.memory_space<vmem>>, vector<1x8x8xbf16>,
      %108 = vector.extract_strided_slice %52 {offsets = [0, 24], sizes = [8, 8], strides = [1, 1]} : vector<8x32xf32> to vector<8x8xf32>
      %109 = arith.truncf %108 : vector<8x8xf32> to vector<8x8xbf16>
      %c3 = arith.constant 3 : index
      %c0_74 = arith.constant 0 : index
      %c0_75 = arith.constant 0 : index
      %110 = vector.load %arg16[%c3, %c0_74, %c0_75] : memref<4x8x8xbf16, #tpu.memory_space<vmem>>, vector<1x8x8xbf16>
      %111 = vector.shape_cast %110 : vector<1x8x8xbf16> to vector<8x8xbf16>
      %112 = vector.shape_cast %109 : vector<8x8xbf16> to vector<1x8x8xbf16>
      tpu.vector_store %arg16[%c3, %c0_74, %c0_75], %112 {strides = array<i32>} : memref<4x8x8xbf16, #tpu.memory_space<vmem>>, vector<1x8x8xbf16>,
      %113 = vector.extract_strided_slice %57 {offsets = [0, 24], sizes = [8, 8], strides = [1, 1]} : vector<8x32xf32> to vector<8x8xf32>
      %114 = arith.truncf %113 : vector<8x8xf32> to vector<8x8xbf16>
      %c3_76 = arith.constant 3 : index
      %c0_77 = arith.constant 0 : index
      %c0_78 = arith.constant 0 : index
      %115 = vector.load %arg17[%c3_76, %c0_77, %c0_78] : memref<4x8x8xbf16, #tpu.memory_space<vmem>>, vector<1x8x8xbf16>
      %116 = vector.shape_cast %115 : vector<1x8x8xbf16> to vector<8x8xbf16>
      %117 = vector.shape_cast %114 : vector<8x8xbf16> to vector<1x8x8xbf16>
      tpu.vector_store %arg17[%c3_76, %c0_77, %c0_78], %117 {strides = array<i32>} : memref<4x8x8xbf16, #tpu.memory_space<vmem>>, vector<1x8x8xbf16>,
      %118 = vector.extract_strided_slice %62 {offsets = [0, 24], sizes = [8, 8], strides = [1, 1]} : vector<8x32xf32> to vector<8x8xf32>
      %119 = arith.truncf %118 : vector<8x8xf32> to vector<8x8xbf16>
      %c3_79 = arith.constant 3 : index
      %c0_80 = arith.constant 0 : index
      %c0_81 = arith.constant 0 : index
      %120 = vector.load %arg18[%c3_79, %c0_80, %c0_81] : memref<4x8x8xbf16, #tpu.memory_space<vmem>>, vector<1x8x8xbf16>
      %121 = vector.shape_cast %120 : vector<1x8x8xbf16> to vector<8x8xbf16>
      %122 = vector.shape_cast %119 : vector<8x8xbf16> to vector<1x8x8xbf16>
      tpu.vector_store %arg18[%c3_79, %c0_80, %c0_81], %122 {strides = array<i32>} : memref<4x8x8xbf16, #tpu.memory_space<vmem>>, vector<1x8x8xbf16>,
    } else {
    }
    %3 = arith.index_cast %arg2 : i32 to index
    %c0 = arith.constant 0 : index
    %c0_1 = arith.constant 0 : index
    %4 = vector.load %arg16[%3, %c0, %c0_1] : memref<4x8x8xbf16, #tpu.memory_space<vmem>>, vector<1x8x8xbf16>
    %5 = vector.shape_cast %4 : vector<1x8x8xbf16> to vector<8x8xbf16>
    %6 = arith.index_cast %arg2 : i32 to index
    %c0_2 = arith.constant 0 : index
    %c0_3 = arith.constant 0 : index
    %7 = vector.load %arg17[%6, %c0_2, %c0_3] : memref<4x8x8xbf16, #tpu.memory_space<vmem>>, vector<1x8x8xbf16>
    %8 = vector.shape_cast %7 : vector<1x8x8xbf16> to vector<8x8xbf16>
    %9 = arith.index_cast %arg2 : i32 to index
    %c0_4 = arith.constant 0 : index
    %c0_5 = arith.constant 0 : index
    %10 = vector.load %arg18[%9, %c0_4, %c0_5] : memref<4x8x8xbf16, #tpu.memory_space<vmem>>, vector<1x8x8xbf16>
    %11 = vector.shape_cast %10 : vector<1x8x8xbf16> to vector<8x8xbf16>
    %cst = arith.constant dense<0.000000e+00> : vector<8x8xf32>
    %12 = tpu.matmul %5, %8, %cst {dimension_numbers = #tpu.dot_dimension_numbers<[1], [1], [0], [0], [0, 0, 1, 0], [], []>} : vector<8x8xbf16>, vector<8x8xbf16>, vector<8x8xf32> -> vector<8x8xf32>
    %c0_6 = arith.constant 0 : index
    %c0_7 = arith.constant 0 : index
    %c0_8 = arith.constant 0 : index
    %c0_9 = arith.constant 0 : index
    %13 = vector.load %arg13[%c0_6, %c0_7, %c0_8, %c0_9] : memref<1x1x8x8xbf16, #tpu.memory_space<vmem>>, vector<1x1x8x8xbf16>
    %14 = vector.shape_cast %13 : vector<1x1x8x8xbf16> to vector<8x8xbf16>
    %15 = arith.extf %14 : vector<8x8xbf16> to vector<8x8xf32>
    %16 = arith.addf %12, %15 : vector<8x8xf32>
    %c0_10 = arith.constant 0 : index
    %c0_11 = arith.constant 0 : index
    %c0_12 = arith.constant 0 : index
    %17 = vector.load %arg14[%c0_10, %c0_11, %c0_12] : memref<1x8x8xbf16, #tpu.memory_space<vmem>>, vector<1x8x8xbf16>
    %18 = vector.shape_cast %17 : vector<1x8x8xbf16> to vector<8x8xbf16>
    %19 = arith.extf %18 : vector<8x8xbf16> to vector<8x8xf32>
    %20 = arith.addf %16, %19 : vector<8x8xf32>
    %cst_13 = arith.constant dense<0xFF800000> : vector<8xf32>
    %21 = vector.multi_reduction <maximumf>, %20, %cst_13 [1] : vector<8x8xf32> to vector<8xf32>
    %22 = vector.shape_cast %21 : vector<8xf32> to vector<8x1xf32>
    %23 = vector.broadcast %22 : vector<8x1xf32> to vector<8x8xf32>
    %24 = arith.subf %20, %23 : vector<8x8xf32>
    %25 = math.exp %24 : vector<8x8xf32>
    %cst_14 = arith.constant dense<0.000000e+00> : vector<8xf32>
    %26 = vector.multi_reduction <add>, %25, %cst_14 [1] : vector<8x8xf32> to vector<8xf32>
    %27 = vector.shape_cast %26 : vector<8xf32> to vector<8x1xf32>
    %28 = arith.truncf %25 : vector<8x8xf32> to vector<8x8xbf16>
    %cst_15 = arith.constant dense<0.000000e+00> : vector<8x8xf32>
    %29 = tpu.matmul %28, %11, %cst_15 {dimension_numbers = #tpu.dot_dimension_numbers<[1], [0], [0], [1], [0, 0, 1, 1], [], []>} : vector<8x8xbf16>, vector<8x8xbf16>, vector<8x8xf32> -> vector<8x8xf32>
    %30 = vector.broadcast %27 : vector<8x1xf32> to vector<8x8xf32>
    %31 = arith.divf %29, %30 : vector<8x8xf32>
    %c0_16 = arith.constant 0 : index
    %c0_17 = arith.constant 0 : index
    %32 = vector.load %arg19[%c0_16, %c0_17] : memref<8x32xf32, #tpu.memory_space<vmem>>, vector<8x32xf32>
    %33 = arith.truncf %31 : vector<8x8xf32> to vector<8x8xbf16>
    %c0_18 = arith.constant 0 : index
    %c0_19 = arith.constant 0 : index
    %c0_20 = arith.constant 0 : index
    %34 = vector.load %arg11[%c0_18, %c0_19, %c0_20] : memref<1x8x32xbf16, #tpu.memory_space<vmem>>, vector<1x8x32xbf16>
    %35 = vector.shape_cast %34 : vector<1x8x32xbf16> to vector<8x32xbf16>
    %cst_21 = arith.constant dense<0.000000e+00> : vector<8x32xf32>
    %36 = tpu.matmul %33, %35, %cst_21 {dimension_numbers = #tpu.dot_dimension_numbers<[1], [0], [0], [1], [0, 0, 1, 1], [], []>} : vector<8x8xbf16>, vector<8x32xbf16>, vector<8x32xf32> -> vector<8x32xf32>
    %37 = arith.addf %32, %36 : vector<8x32xf32>
    %c0_22 = arith.constant 0 : index
    %c0_23 = arith.constant 0 : index
    %38 = vector.load %arg19[%c0_22, %c0_23] : memref<8x32xf32, #tpu.memory_space<vmem>>, vector<8x32xf32>
    tpu.vector_store %arg19[%c0_22, %c0_23], %37 {strides = array<i32>} : memref<8x32xf32, #tpu.memory_space<vmem>>, vector<8x32xf32>,
    %c3_i32 = arith.constant 3 : i32
    %39 = arith.cmpi eq, %arg2, %c3_i32 : i32
    %40 = arith.extui %39 : i1 to i32
    %c0_i32_24 = arith.constant 0 : i32
    %41 = arith.cmpi ne, %40, %c0_i32_24 : i32
    scf.if %41 {
      %c0_25 = arith.constant 0 : index
      %c0_26 = arith.constant 0 : index
      %42 = vector.load %arg19[%c0_25, %c0_26] : memref<8x32xf32, #tpu.memory_space<vmem>>, vector<8x32xf32>
      %c0_27 = arith.constant 0 : index
      %c0_28 = arith.constant 0 : index
      %43 = vector.load %arg12[%c0_27, %c0_28] : memref<1x32xf32, #tpu.memory_space<vmem>>, vector<1x32xf32>
      %44 = vector.broadcast %43 : vector<1x32xf32> to vector<8x32xf32>
      %45 = arith.addf %42, %44 : vector<8x32xf32>
      %c0_29 = arith.constant 0 : index
      %c0_30 = arith.constant 0 : index
      %c0_31 = arith.constant 0 : index
      %46 = vector.load %arg15[%c0_29, %c0_30, %c0_31] : memref<1x8x32xf32, #tpu.memory_space<vmem>>, vector<1x8x32xf32>
      %47 = vector.shape_cast %46 : vector<1x8x32xf32> to vector<8x32xf32>
      %48 = vector.shape_cast %45 : vector<8x32xf32> to vector<1x8x32xf32>
      tpu.vector_store %arg15[%c0_29, %c0_30, %c0_31], %48 {strides = array<i32>} : memref<1x8x32xf32, #tpu.memory_space<vmem>>, vector<1x8x32xf32>,
    } else {
    }
    return
  }
  func.func @transform_0(%arg0: i32, %arg1: i32, %arg2: i32) -> (i32, i32, i32) {
    %c0_i32 = arith.constant 0 : i32
    %c0_i32_0 = arith.constant 0 : i32
    return %arg0, %arg1, %c0_i32 : i32, i32, i32
  }
  func.func @transform_1(%arg0: i32, %arg1: i32, %arg2: i32) -> (i32, i32, i32) {
    %c0_i32 = arith.constant 0 : i32
    %c0_i32_0 = arith.constant 0 : i32
    %c0_i32_1 = arith.constant 0 : i32
    return %arg0, %c0_i32, %c0_i32_0 : i32, i32, i32
  }
  func.func @transform_2(%arg0: i32, %arg1: i32, %arg2: i32) -> (i32, i32) {
    %c0_i32 = arith.constant 0 : i32
    %c0_i32_0 = arith.constant 0 : i32
    %c0_i32_1 = arith.constant 0 : i32
    return %c0_i32, %c0_i32_0 : i32, i32
  }
  func.func @transform_3(%arg0: i32, %arg1: i32, %arg2: i32) -> (i32, i32) {
    %c0_i32 = arith.constant 0 : i32
    %c0_i32_0 = arith.constant 0 : i32
    %c0_i32_1 = arith.constant 0 : i32
    return %c0_i32, %c0_i32_0 : i32, i32
  }
  func.func @transform_4(%arg0: i32, %arg1: i32, %arg2: i32) -> (i32, i32) {
    %c0_i32 = arith.constant 0 : i32
    %c0_i32_0 = arith.constant 0 : i32
    %c0_i32_1 = arith.constant 0 : i32
    return %c0_i32, %c0_i32_0 : i32, i32
  }
  func.func @transform_5(%arg0: i32, %arg1: i32, %arg2: i32) -> (i32, i32) {
    %c0_i32 = arith.constant 0 : i32
    %c0_i32_0 = arith.constant 0 : i32
    %c0_i32_1 = arith.constant 0 : i32
    return %c0_i32, %c0_i32_0 : i32, i32
  }
  func.func @transform_6(%arg0: i32, %arg1: i32, %arg2: i32) -> (i32, i32) {
    %c0_i32 = arith.constant 0 : i32
    %c0_i32_0 = arith.constant 0 : i32
    %c0_i32_1 = arith.constant 0 : i32
    return %c0_i32, %c0_i32_0 : i32, i32
  }
  func.func @transform_7(%arg0: i32, %arg1: i32, %arg2: i32) -> (i32, i32) {
    %c0_i32 = arith.constant 0 : i32
    %c0_i32_0 = arith.constant 0 : i32
    %c0_i32_1 = arith.constant 0 : i32
    return %c0_i32, %c0_i32_0 : i32, i32
  }
  func.func @transform_8(%arg0: i32, %arg1: i32, %arg2: i32) -> (i32, i32, i32) {
    %c0_i32 = arith.constant 0 : i32
    %c0_i32_0 = arith.constant 0 : i32
    %c0_i32_1 = arith.constant 0 : i32
    return %arg2, %c0_i32, %c0_i32_0 : i32, i32, i32
  }
  func.func @transform_9(%arg0: i32, %arg1: i32, %arg2: i32) -> (i32, i32) {
    %c0_i32 = arith.constant 0 : i32
    %c0_i32_0 = arith.constant 0 : i32
    %c0_i32_1 = arith.constant 0 : i32
    return %c0_i32, %c0_i32_0 : i32, i32
  }
  func.func @transform_10(%arg0: i32, %arg1: i32, %arg2: i32) -> (i32, i32, i32, i32) {
    %c0_i32 = arith.constant 0 : i32
    %c0_i32_0 = arith.constant 0 : i32
    return %arg0, %arg2, %arg1, %c0_i32 : i32, i32, i32, i32
  }
  func.func @transform_11(%arg0: i32, %arg1: i32, %arg2: i32) -> (i32, i32, i32) {
    %c0_i32 = arith.constant 0 : i32
    %c0_i32_0 = arith.constant 0 : i32
    return %arg0, %arg1, %c0_i32 : i32, i32, i32
  }
  func.func @transform_12(%arg0: i32, %arg1: i32, %arg2: i32) -> (i32, i32, i32) {
    %c0_i32 = arith.constant 0 : i32
    %c0_i32_0 = arith.constant 0 : i32
    return %arg0, %arg1, %c0_i32 : i32, i32, i32
  }
}

</mosaic_0001>

<bundles_post_ra>
// kernel: tpu_custom_call.1
= control target key start
LH: loop header
LB: loop body
LE: loop exit
PB: predicated region body
PF: predicated region fallthrough
CT: control target
= control target key end

     0   :  { %s2437_s0 = inlined_call_operand.hbm [shape: bf16[2,8,32], index: 0, kind: input, shape index: {}]   ;;  %s2438_s1 = inlined_call_operand.hbm [shape: bf16[2,8,32], index: 1, kind: input, shape index: {}]   ;;  %s2439_s2 = inlined_call_operand.hbm [shape: bf16[32,32], index: 2, kind: input, shape index: {}]   ;;  %s2440_s3 = inlined_call_operand.hbm [shape: bf16[32,32], index: 3, kind: input, shape index: {}]   ;;  %s2441_s4 = inlined_call_operand.hbm [shape: bf16[32,32], index: 4, kind: input, shape index: {}]   ;;  %s2442_s5 = inlined_call_operand.vmem [shape: f32[1,32], index: 5, kind: input, shape index: {}]   ;;  %s2443_s6 = inlined_call_operand.vmem [shape: f32[1,32], index: 6, kind: input, shape index: {}]   ;;  %s2444_s7 = inlined_call_operand.hbm [shape: f32[1,32], index: 7, kind: input, shape index: {}]   ;;  %s2445_s8 = inlined_call_operand.hbm [shape: bf16[4,8,32], index: 8, kind: input, shape index: {}]   ;;  %s2446_s9 = inlined_call_operand.hbm [shape: f32[1,32], index: 9, kind: input, shape index: {}]   ;;  %s2447_s10 = inlined_call_operand.hbm [shape: bf16[2,4,8,8], index: 10, kind: input, shape index: {}]   ;;  %s2448_s11 = inlined_call_operand.vmem [shape: bf16[2,8,8], index: 11, kind: input, shape index: {}]   ;;  %s2449_s12 = inlined_call_operand.hbm [shape: f32[2,8,32], index: 12, kind: output, shape index: {}]  }
   0x1   :  { %2473 = sst [smem:[#allocation44_spill]] %s2437_s0 }
   0x2   :  { %2474 = sst [smem:[#allocation45_spill]] %s2438_s1 }
   0x3   :  { %2475 = sst [smem:[#allocation46_spill]] %s2439_s2 }
   0x4   :  { %2476 = sst [smem:[#allocation47_spill]] %s2440_s3 }
   0x5   :  { %2477 = sst [smem:[#allocation48_spill]] %s2441_s4 }
   0x6   :  { %2478 = sst [smem:[#allocation49_spill]] %s2442_s5 }
   0x7   :  { %2479 = sst [smem:[#allocation50_spill]] %s2443_s6 }
   0x8   :  { %2480 = sst [smem:[#allocation51_spill]] %s2444_s7 }
   0x9   :  { %2481 = sst [smem:[#allocation52_spill]] %s2445_s8 }
   0xa   :  { %2482 = sst [smem:[#allocation53_spill]] %s2446_s9 }
   0xb   :  { %2483 = sst [smem:[#allocation54_spill]] %s2447_s10 }
   0xc   :  { %2484 = sst [smem:[#allocation55_spill]] %s2448_s11 }
   0xd   :  { %2485 = sst [smem:[#allocation56_spill]] %s2449_s12 }
   0xe   :  { %17 = vsyncpa [#allocation7], 0 }
   0xf   :  { %19 = vsyncpa [#allocation7 + $0x1], 0 }
  0x10   :  { %20 = vsyncpa [#allocation10], 0 }
  0x11   :  { %22 = vsyncpa [#allocation10 + $0x1], 0 }
  0x12   :  { %23 = vsyncpa [#allocation13], 0 }
  0x13   :  { %24 = vsyncpa [#allocation16], 0 }
  0x14   :  { %25 = vsyncpa [#allocation8], 0 }
  0x15   :  { %27 = vsyncpa [#allocation8 + $0x1], 0  ;;  %s2003_s21 = smov 0   ;;  %s2005_s22 = smov 0  }
  0x16   :  { %s2007_s23 = smov 0   ;;  %s2009_s24 = smov 0  }
  0x17   :  { %s2011_s25 = smov 0   ;;  %s2013_s26 = smov 0  }
  0x18   :  { %s2015_s27 = smov 0   ;;  %s2017_s28 = smov 0  }
  0x19   :  { %s2019_s29 = smov 0   ;;  %s2021_s30 = smov 0  }
  0x1a   :  { %s2023_s13 = smov 0   ;;  %s2025_s14 = smov 0  }
  0x1b   :  { %s2027_s15 = smov 0   ;;  %s2029_s16 = smov 0  }
  0x1c LB: > { %2486 = sst [smem:[#allocation30_spill]] %s1873_s21  ;;  %s2074_s17 = sadd.s32 4294967295, %s1925_s16   ;;  %s1925_s16 = sphi %s2029_s16, %s33_s16   ;;  %s1921_s15 = sphi %s2027_s15, %s2567_s15   ;;  %s1917_s14 = sphi %s2025_s14, %s2566_s14   ;;  %s1913_s13 = sphi %s2023_s13, %s2565_s13   ;;  %s1909_s30 = sphi %s2021_s30, %s2564_s30   ;;  %s1905_s29 = sphi %s2019_s29, %s2563_s29   ;;  %s1901_s28 = sphi %s2017_s28, %s2562_s28   ;;  %s1897_s27 = sphi %s2015_s27, %s2555_s27   ;;  %s1893_s26 = sphi %s2013_s26, %s2561_s26   ;;  %s1889_s25 = sphi %s2011_s25, %s2560_s25   ;;  %s1885_s24 = sphi %s2009_s24, %s2559_s24   ;;  %s1881_s23 = sphi %s2007_s23, %s2558_s23   ;;  %s1877_s22 = sphi %s2005_s22, %s2557_s22   ;;  %s1873_s21 = sphi %s2003_s21, %s2553_s21  }
  0x1d   : > { %2487 = sst [smem:[#allocation31_spill]] %s1877_s22  ;;  %p1202_p0 = scmp.ge.s32.totalorder %s1925_s16, 1 }
  0x1e   : > { %2488 = sst [smem:[#allocation32_spill]] %s1889_s25  ;;  %p75_p1 = scmp.eq.s32.totalorder %s2074_s17, 0 }
  0x1f   : > { %2489 = sst [smem:[#allocation33_spill]] %s1897_s27  ;;  %p370_p2 = scmp.lt.s32.totalorder %s1925_s16, 9 }
  0x20   : > { %2490 = sst [smem:[#allocation34_spill]] %s1901_s28  ;;  %s1927_s6 = smov [#allocation11]  }
  0x21   : > { %2491 = sst [smem:[#allocation35_spill]] %s1909_s30  ;;  %p2082_p3 = pnand %p1202_p0, %p370_p2 }
  0x22   : > { %2492 = sst [smem:[#allocation36_spill]] %s1913_s13  ;;  %s383_s5 = sshll.u32 %s1927_s6, 4  ;;  %s384_s5 = int_to_ptr.vmem [resolvable:$true] %s383_s5 }
  0x23   : > { %2493 = sst [smem:[#allocation37_spill]] %s2074_s17  ;;  %p1305_p4 = pneg %p2082_p3 }
  0x24   : > { %s2494_s2 = sld [smem:[#allocation46_spill]]  ;;  %s2454_s19 = smov 64  }
  0x25   : > { %s2495_s12 = scalar_select %p2082_p3, 1, 0 }
  0x26   : > { %p2090_p5 = pnand %p1305_p4, %p75_p1  ;;  %s1201_s30 = sadd.s32 4294967294, %s1925_s16  }
  0x27   : > { %2496 = sst [smem:[#allocation38_spill]] %s2495_s12  ;;  %p68_p6 = scmp.ne.s32.totalorder %s1905_s29, %s1901_s28 }
  0x28   : > { %p69_p7 = scmp.eq.s32.totalorder %s1925_s16, 0  ;;  %p74_p8 = scmp.ne.s32.totalorder %s1901_s28, %s1897_s27 }
  0x29   : > { %p357_p9 = scmp.eq.s32.totalorder %s2074_s17, 7  ;;  %p363_p11 = scmp.eq.s32.totalorder %s1201_s30, 7 }
  0x2a   : > { %s381_s20 = sshll.u32 %s2494_s2, 4  ;;  %s2456_s2 = smov 4   ;;  %s382_s20 = int_to_ptr.hbm [resolvable:$true] %s381_s20 }
  0x2b   : > { %1308 = dma.hbm_to_vmem [thread:$0]  (!%p2090_p5), %s382_s20, 256, %s384_s5, [#allocation10], %s2454_s19, %s2454_s19, %s2456_s2  }
  0x2c   : > { %p2110_p10 = por %p69_p7, %p68_p6  ;;  %p2116_p12 = por %p75_p1, %p74_p8 }
  0x2d   : > { %p2120_p13 = por %p357_p9, %p68_p6  ;;  %p2124_p0 = por %p363_p11, %p74_p8 }
  0x2e   : > { %s2499_s12 = scalar_select %p2116_p12, 1, 0 }
  0x2f   : > { %s2501_s5 = scalar_select %p2120_p13, 1, 0 }
  0x30   : > { %2500 = sst [smem:[#allocation39_spill]] %s2499_s12  ;;  %p2465_p2 = scmp.lt.s32.totalorder %s1925_s16, 8 }
  0x31   : > { %2502 = sst [smem:[#allocation40_spill]] %s2501_s5  ;;  %s457_s6 = sand.u32 1, %s1905_s29  }
  0x32   : > { %s2503_s20 = scalar_select %p2124_p0, 1, 0 }
  0x33   : > { %s2131_s19 = sshll.u32 %s457_s6, 2  ;;  %s2134_s30 = sshll.u32 %s1921_s15, 2 }
  0x34   : > { %2504 = sst [smem:[#allocation41_spill]] %s2503_s20  ;;  %s459_s28 = scalar_lea.vmem [#allocation6], %s2131_s19 }
  0x35   : > { %s2505_s0 = sld [smem:[#allocation44_spill]]  ;;  %s468_s5 = sshll.u32 %s459_s28, 4  ;;  %s469_s5 = int_to_ptr.vmem [resolvable:$true] %s468_s5 }
  0x36   : > { %p2145_p4 = pnand %p2465_p2, %p2110_p10  ;;  %s2507_s3 = sld [smem:[#allocation47_spill]] }
  0x37   : > { %s2508_s27 = sand.u32 1, %s1925_s16   ;;  %s2509_s9 = sld [smem:[#allocation53_spill]] }
  0x38   : > { %s239_s13 = sadd.s32 1, %s1893_s26  ;;  %p246_p8 = scmp.ne.s32.totalorder %s1893_s26, %s1889_s25 }
  0x39   : > { %p252_p9 = scmp.ne.s32.totalorder %s1889_s25, %s1885_s24  ;;  %s2513_s11 = sadd.s32 1, %s1921_s15 }
  0x3a   : > { %p2184_p10 = por %p246_p8, %p69_p7  ;;  %s496_s24 = sand.u32 1, %s1893_s26  }
  0x3b   : > { %s464_s12 = scalar_lea.hbm %s2505_s0, %s2134_s30  ;;  %s2154_s0 = scalar_lea.sflag [#allocation7], %s2508_s27 }
  0x3c   : > { %s466_s10 = sshll.u32 %s464_s12, 4  ;;  %s395_s2 = sshll.u32 %s2507_s3, 4  ;;  %s467_s10 = int_to_ptr.hbm [resolvable:$true] %s466_s10  ;;  %s396_s2 = int_to_ptr.hbm [resolvable:$true] %s395_s2 }
  0x3d   : > { %1324 = dma.hbm_to_vmem [thread:$0]  (!%p2145_p4), %s467_s10, 64, %s469_s5, %s2154_s0  }
  0x3e   : > { %s1930_s12 = smov [#allocation12]   ;;  %s442_s20 = sshll.u32 %s2509_s9, 4  ;;  %s443_s20 = int_to_ptr.hbm [resolvable:$true] %s442_s20 }
  0x3f   : > { %s397_s28 = sshll.u32 %s1930_s12, 4  ;;  %s2510_s27 = smov 4   ;;  %s398_s28 = int_to_ptr.vmem [resolvable:$true] %s397_s28 }
  0x40   : > { %s2511_s3 = smov 64   ;;  %s1931_s10 = smov [#allocation18]  }
  0x41   : > { %1311 = dma.hbm_to_vmem [thread:$0]  (!%p2090_p5), %s396_s2, 256, %s398_s28, [#allocation13], %s2511_s3, %s2511_s3, %s2510_s27  }
  0x42   : > { %s444_s5 = sshll.u32 %s1931_s10, 4  ;;  %s45_s12 = sadd.s32 1, %s1917_s14  ;;  %s445_s5 = int_to_ptr.vmem [resolvable:$true] %s444_s5 }
  0x43   : > { %1320 = dma.hbm_to_vmem [thread:$0]  (!%p2090_p5), %s443_s20, 16, %s445_s5, [#allocation10]  }
  0x44   : > { %p46_p6 = scmp.ge.s32.totalorder %s45_s12, 4  ;;  %p2190_p0 = por %p252_p9, %p75_p1 }
  0x45   : > { %s1213_s9 = sshll.u32 %s496_s24, 2  ;;  %s2518_s17 = sadd.s32 1, %s1905_s29 }
  0x46   : > { %s2569_s12 = smov (%p46_p6, %s45_s12), 0  ;;  %s2571_s11 = smov (!%p46_p6, %s2513_s11), %s1921_s15 }
  0x47   : > { %2512 = sst [smem:[#allocation42_spill]] %s2569_s12  ;;  %s236_s2 = ssub.s32 %s1917_s14, %s2569_s12 }
  0x48   : > { %p54_p11 = scmp.ge.s32.totalorder %s2571_s11, 2  ;;  %p237_p2 = scmp.eq.s32.totalorder %s236_s2, 0 }
  0x49   : > { %s2515_s20 = scalar_select %p2190_p0, 1, 0 }
  0x4a   : > { %s2573_s11 = smov (%p54_p11, %s2571_s11), 0  ;;  %s498_s21 = scalar_lea.vmem [#allocation17], %s1213_s9 }
  0x4b   : > { %2516 = sst [smem:[#allocation43_spill]] %s2515_s20  ;;  %s56_s5 = ssub.s32 %s1921_s15, %s2573_s11 }
  0x4c   : > { %s2198_s10 = scalar_select %p237_p2, %s1893_s26, %s239_s13  }
  0x4d   : > { %p59_p6 = scmp.eq.s32.totalorder %s56_s5, 0  ;;  %s285_s12 = sor.u32 %s236_s2, %s56_s5 }
  0x4e   : > { %p2202_p8 = scmp.eq.s32.totalorder %s285_s12, 0  ;;  %s1214_s20 = sshll.u32 %s1917_s14, 2 }
  0x4f   : > { %s2209_s1 = scalar_select %p59_p6, %s1905_s29, %s2518_s17  }
  0x50   : > { %s506_s22 = sshll.u32 %s498_s21, 4  ;;  %s2519_s8 = sld [smem:[#allocation52_spill]]  ;;  %s507_s22 = int_to_ptr.vmem [resolvable:$true] %s506_s22 }
  0x51   : > { %p2520_p2 = scmp.lt.s32.totalorder %s1925_s16, 8  ;;  %s2521_s4 = sld [smem:[#allocation48_spill]] }
  0x52   : > { %s2522_s7 = sld [smem:[#allocation51_spill]]  ;;  %s1932_s27 = smov [#allocation14]  }
  0x53   : > { %p1328_p9 = pnand %p2520_p2, %p2184_p10  ;;  %s2523_s28 = smov 4  }
  0x54   : > { %s2524_s5 = smov 64   ;;  %s2527_s21 = sld [smem:[#allocation45_spill]] }
  0x55   : > { %s515_s2 = sand.u32 1, %s1881_s23   ;;  %s522_s9 = sadd.s32 %s1917_s14, %s2134_s30 }
  0x56   : > { %s502_s13 = scalar_lea.hbm %s2519_s8, %s1214_s20  ;;  %s411_s20 = sshll.u32 %s1932_s27, 4  ;;  %s412_s20 = int_to_ptr.vmem [resolvable:$true] %s411_s20 }
  0x57   : > { %s504_s24 = sshll.u32 %s502_s13, 4  ;;  %s409_s17 = sshll.u32 %s2521_s4, 4  ;;  %s505_s24 = int_to_ptr.hbm [resolvable:$true] %s504_s24  ;;  %s410_s17 = int_to_ptr.hbm [resolvable:$true] %s409_s17 }
  0x58   : > { %1330 = dma.hbm_to_vmem [thread:$0]  (!%p1328_p9), %s505_s24, 64, %s507_s22, %s2154_s0  }
  0x59   : > { %s430_s3 = sshll.u32 %s2522_s7, 4  ;;  %s2525_s13 = sld [smem:[#allocation31_spill]]  ;;  %s431_s3 = int_to_ptr.hbm [resolvable:$true] %s430_s3 }
  0x5a   : > { %1314 = dma.hbm_to_vmem [thread:$0]  (!%p2090_p5), %s410_s17, 256, %s412_s20, [#allocation13], %s2524_s5, %s2524_s5, %s2523_s28  }
  0x5b   : > { %s2526_s22 = sld [smem:[#allocation30_spill]]  ;;  %s1933_s24 = smov [#allocation15]  }
  0x5c   : > { %s432_s12 = sshll.u32 %s1933_s24, 4  ;;  %s483_s27 = scalar_lea.hbm %s2527_s21, %s2134_s30  ;;  %s433_s12 = int_to_ptr.vmem [resolvable:$true] %s432_s12 }
  0x5d   : > { %s485_s7 = sshll.u32 %s483_s27, 4  ;;  %s479_s8 = scalar_lea.vmem [#allocation9], %s2131_s19  ;;  %s486_s7 = int_to_ptr.hbm [resolvable:$true] %s485_s7 }
  0x5e   : > { %1317 = dma.hbm_to_vmem [thread:$0]  (!%p2090_p5), %s431_s3, 16, %s433_s12, [#allocation16]  }
  0x5f   : > { %s487_s17 = sshll.u32 %s479_s8, 4  ;;  %s2529_s20 = sand.u32 1, %s1925_s16   ;;  %s488_s17 = int_to_ptr.vmem [resolvable:$true] %s487_s17 }
  0x60   : > { %s476_s28 = scalar_lea.sflag [#allocation10], %s2529_s20  ;;  %s290_s5 = sadd.s32 1, %s1881_s23 }
  0x61   : > { %1327 = dma.hbm_to_vmem [thread:$0]  (!%p2145_p4), %s486_s7, 64, %s488_s17, %s476_s28  }
  0x62   : > { %s2246_s24 = scalar_select %p2202_p8, %s1881_s23, %s290_s5  }
  0x63   : > { %p297_p10 = scmp.ne.s32.totalorder %s1881_s23, %s2525_s13  ;;  %p303_p11 = scmp.ne.s32.totalorder %s2525_s13, %s2526_s22 }
  0x64   : > { %s1215_s18 = sshll.u32 %s515_s2, 2  ;;  %s1217_s19 = sshll.u32 %s522_s9, 2 }
  0x65   : > { %p299_p5 = por %p297_p10, %p69_p7  ;;  %p2259_p6 = por %p303_p11, %p75_p1 }
  0x66   : > { %s2531_s25 = sld [smem:[#allocation54_spill]]  ;;  %s517_s21 = scalar_lea.vmem [#allocation19], %s1215_s18 }
  0x67   : > { %s528_s27 = sshll.u32 %s517_s21, 4  ;;  %p2532_p4 = pmov %p2520_p2  ;;  %s529_s27 = int_to_ptr.vmem [resolvable:$true] %s528_s27 }
  0x68   : > { %s2534_s4 = sld [smem:[#allocation37_spill]] (!%p2082_p3) }
  0x69   : > { %p1331_p8 = pnand %p2532_p4, %p299_p5  ;;  %s2535_s13 = sld [smem:[#allocation34_spill]] (!%p2082_p3) }
  0x6a   : > { %547 = sbr.rel (%p2082_p3) target bundleno = 1010 (0x3f2), region = 68 }
  0x6c   : > { %s524_s3 = scalar_lea.hbm %s2531_s25, %s1217_s19 }
  0x6d   : > { %s526_s12 = sshll.u32 %s524_s3, 4  ;;  %s527_s12 = int_to_ptr.hbm [resolvable:$true] %s526_s12 }
  0x6e   : > { %1333 = dma.hbm_to_vmem [thread:$0]  (!%p1331_p8), %s527_s12, 64, %s529_s27, %s2154_s0  }
  0x6f   : > { %s549_s17 = sand.u32 1, %s2534_s4   ;;  %s2273_s20 = sand.u32 1, %s2535_s13  }
  0x70   : > { %s1219_s28 = sshll.u32 %s2273_s20, 2  ;;  %s550_s5 = scalar_lea.sflag [#allocation7], %s549_s17 }
  0x71   : > { %s2276_s2 = scalar_lea.vmem [#allocation6], %s1219_s28 }
  0x72   : > { %1836 = dma.done.wait (%p2116_p12), %s550_s5, 64  }
  0x73   : > { %1838 = vsyncadd (%p2116_p12), %s550_s5, 4294967232  ;;  %s560_s0 = scalar_lea.sflag [#allocation10], %s549_s17  ;;  %s2282_s9 = scalar_lea.vmem [#allocation9], %s1219_s28 }
  0x74   : > { %1840 = dma.done.wait (%p2116_p12), %s560_s0, 64  }
  0x75   : > { %1842 = vsyncadd (%p2116_p12), %s560_s0, 4294967232 }
  0x76   : > { %1844 = dma.done.wait (%p75_p1), [#allocation10], 256  }
  0x77   : > { %1846 = vsyncadd (%p75_p1), [#allocation10], 4294967040 }
  0x78   : > { %1848 = dma.done.wait (%p75_p1), [#allocation13], 512  }
  0x79   : > { %1850 = vsyncadd (%p75_p1), [#allocation13], 4294966784 }
  0x7a   : > { %1852 = dma.done.wait (%p75_p1), [#allocation16], 16  }
  0x7b   : > { %1854 = vsyncadd (%p75_p1), [#allocation16], 4294967280  ;;  %s2537_s18 = sld [smem:[#allocation32_spill]] }
  0x81   : > { %s591_s7 = sand.u32 1, %s2537_s18  }
  0x82   : > { %s2301_s6 = sshll.u32 %s591_s7, 2 }
  0x83   : > { %s593_s25 = scalar_lea.vmem [#allocation17], %s2301_s6 }
  0x84   : > { %1856 = dma.done.wait (%p2190_p0), %s550_s5, 64  }
  0x85   : > { %1858 = vsyncadd (%p2190_p0), %s550_s5, 4294967232 }
  0x86   : > { %1860 = dma.done.wait (%p75_p1), [#allocation10], 16  }
  0x87   : > { %1862 = vsyncadd (%p75_p1), [#allocation10], 4294967280  ;;  %s2539_s3 = sld [smem:[#allocation31_spill]] }
  0x8d   : > { %s606_s12 = sand.u32 1, %s2539_s3  }
  0x8e   : > { %s2313_s21 = sshll.u32 %s606_s12, 2 }
  0x8f   : > { %s608_s27 = scalar_lea.vmem [#allocation19], %s2313_s21 }
  0x90   : > { %1864 = dma.done.wait (%p2259_p6), %s550_s5, 64  }
  0x91   : > { %1866 = vsyncadd (%p2259_p6), %s550_s5, 4294967232  ;;  %s2540_s30 = sld [smem:[#allocation36_spill]]  ;;  %s1228_s13 = sshll.u32 %s2273_s20, 3 }
  0x92   : > { %s2541_s28 = sld [smem:[#allocation55_spill]]  ;;  %s2328_s18 = scalar_lea.vmem [#allocation20], %s1228_s13 }
  0x93   : > { %s2542_s19 = sld [smem:[#allocation35_spill]] }
  0x97   : > { %p672_p3 = scmp.lt.s32.totalorder %s2540_s30, 1 }
  0x99   : > { %s2575_s30 = smov (!%p672_p3, %s2540_s30), 1  ;;  %p1230_p1 = scmp.ne.s32.totalorder %s2542_s19, 0 }
  0x9a   : > { %s1229_s4 = sshll.u32 %s2575_s30, 2  ;;  %s2543_s7 = sld [smem:[#allocation49_spill]] (!%p1230_p1) }
  0x9b   : > { %s2326_s0 = scalar_lea.vmem %s2541_s28, %s1229_s4  ;;  %683 = sbr.rel (%p1230_p1) target bundleno = 431 (0x1af), region = 108 }
  0x9c   : > { %s2544_s30 = sld [smem:[#allocation50_spill]] (!%p1230_p1)  ;;  %s1937_s13 = smov (!%p1230_p1), 104  }
  0xa0   : > { %v1270_v0 = vld [vmem:[#allocation11 + $0x8] sm:$0xff]  ;;  %v1272_v1 = vld [vmem:[#allocation12 + $0x8] sm:$0xff]  ;;  %vm684_vm0 = vcmask 261120   ;;  %v1934_v3 = vmov 0.0   ;;  %v1269_v4 = vld [vmem:[#allocation11] sm:$0xff]  ;;  %vm794_vm1 = vcmask 60416  }
  0xa1   : > { %v1274_v2 = vld [vmem:[#allocation14 + $0x8] sm:$0xff]  ;;  %685 = vst.msk [vmem:[#allocation5] sm:$0xff] %vm684_vm0, %v1934_v3  ;;  %717 = vmatpush.bf16.msra.mxu0 %v1270_v0  ;;  %753 = vmatpush.bf16.msra.mxu1 %v1272_v1  ;;  %v1271_v5 = vld [vmem:[#allocation12] sm:$0xff]  ;;  %v1273_v6 = vld [vmem:[#allocation14] sm:$0xff] }
  0xa2   : > { %786 = vmatpush.bf16.msra.mxu2 %v1274_v2  ;;  %v686_v7 = vld [vmem:[%s2276_s2] sm:$0xf]  ;;  %v687_v8 = vld [vmem:[%s2282_s9] sm:$0xf]  ;;  %s1935_s2 = smov 112   ;;  %s1936_s9 = smov 120  }
  0xa3   : > { %v1473_v9 = vld [vmem:[%s2543_s7] ss:$0 sm:$0xff]  ;;  %v1475_v17 = vld [vmem:[#allocation15] ss:$0 sm:$0xff] }
  0xa4   : > { %v1474_v10 = vld [vmem:[%s2544_s30] ss:$0 sm:$0xff] }
  0xa5   : > { %718 = vmatpush.bf16.msra.mxu0 %v1269_v4  ;;  %754 = vmatpush.bf16.msra.mxu1 %v1271_v5 }
  0xa6   : > { %787 = vmatpush.bf16.msra.mxu2 %v1273_v6 }
  0xa8   : > { %1239 = vmatmul.msk.bf16.vlgmr.msra.gmra.mxu0 %vm684_vm0, %v686_v7  ;;  %1248 = vmatmul.msk.bf16.vlgmr.msra.gmra.mxu1 %vm684_vm0, %v687_v8 }
  0xa9   : > { %1257 = vmatmul.msk.bf16.vlgmr.msra.gmra.mxu2 %vm684_vm0, %v687_v8 }
 0x125   : > { %v720_v11 = vpop.f32.mrf.mxu0  ;;  %v756_v12 = vpop.f32.mrf.mxu1 }
 0x126   : > { %v721_v13 = vadd.f32 %v1473_v9, %v720_v11  ;;  %v757_v14 = vadd.f32 %v1474_v10, %v756_v12 }
 0x128   : > { %v793_v15 = vpack.c.bf16 %v721_v13, %v721_v13  ;;  %v796_v16 = vpack.c.bf16 %v757_v14, %v757_v14 }
 0x12a   : > { %795 = vst.msk [vmem:[#allocation2] sm:$0xf] %vm794_vm1, %v793_v15  ;;  %823 = vrot.lane.b32.xlu2 %v796_v16, %s1935_s2  ;;  %818 = vrot.lane.b32.xlu1 %v793_v15, %s1935_s2 }
 0x12b   : > { %797 = vst.msk [vmem:[#allocation3] sm:$0xf] %vm794_vm1, %v796_v16  ;;  %801 = vrot.lane.b32.xlu0 %v793_v15, %s1936_s9 }
 0x12c   : > { %v789_v18 = vpop.f32.mrf.mxu2 }
 0x12d   : > { %v790_v19 = vadd.f32 %v1475_v17, %v789_v18  ;;  %v722_v20 = vpop.f32.mrf.mxu0  ;;  %v758_v21 = vpop.f32.mrf.mxu1 }
 0x12f   : > { %v798_v22 = vpack.c.bf16 %v790_v19, %v790_v19 }
 0x131   : > { %799 = vst.msk [vmem:[#allocation4] sm:$0xf] %vm794_vm1, %v798_v22 }
 0x132   : > { %828 = vrot.lane.b32.xlu2 %v798_v22, %s1935_s2  ;;  %813 = vrot.lane.b32.xlu1 %v798_v22, %s1936_s9 }
 0x133   : > { %807 = vrot.lane.b32.xlu0 %v796_v16, %s1936_s9 }
 0x134   : > { %v791_v23 = vpop.f32.mrf.mxu2 }
 0x13a   : > { %843 = vrot.lane.b32.xlu2 %v798_v22, %s1937_s13  ;;  %838 = vrot.lane.b32.xlu1 %v796_v16, %s1937_s13 }
 0x13b   : > { %833 = vrot.lane.b32.xlu0 %v793_v15, %s1937_s13 }
 0x184   : > { %v824_v24 = vpop.permute.xlu2 %823 }
 0x185   : > { %827 = vst.msk [vmem:[#allocation3 + $0x8] sm:$0xf] %vm794_vm1, %v824_v24 }
 0x18c   : > { %v829_v25 = vpop.permute.xlu2 %828 }
 0x18d   : > { %832 = vst.msk [vmem:[#allocation4 + $0x8] sm:$0xf] %vm794_vm1, %v829_v25 }
 0x194   : > { %v844_v26 = vpop.permute.xlu2 %843 }
 0x195   : > { %847 = vst.msk [vmem:[#allocation4 + $0xc] sm:$0xf] %vm794_vm1, %v844_v26 }
 0x19c   : > { %v819_v27 = vpop.permute.xlu1 %818 }
 0x19d   : > { %822 = vst.msk [vmem:[#allocation2 + $0x8] sm:$0xf] %vm794_vm1, %v819_v27  ;;  %v802_v28 = vpop.permute.xlu0 %801 }
 0x19e   : > { %805 = vst.msk [vmem:[#allocation2 + $0x4] sm:$0xf] %vm794_vm1, %v802_v28 }
 0x1a4   : > { %v814_v29 = vpop.permute.xlu1 %813 }
 0x1a5   : > { %817 = vst.msk [vmem:[#allocation4 + $0x4] sm:$0xf] %vm794_vm1, %v814_v29  ;;  %v808_v30 = vpop.permute.xlu0 %807 }
 0x1a6   : > { %811 = vst.msk [vmem:[#allocation3 + $0x4] sm:$0xf] %vm794_vm1, %v808_v30 }
 0x1ac   : > { %v839_v31 = vpop.permute.xlu1 %838 }
 0x1ad   : > { %842 = vst.msk [vmem:[#allocation3 + $0xc] sm:$0xf] %vm794_vm1, %v839_v31  ;;  %v834_v32 = vpop.permute.xlu0 %833 }
 0x1ae   : > { %837 = vst.msk [vmem:[#allocation2 + $0xc] sm:$0xf] %vm794_vm1, %v834_v32 }
 0x1af PF: > { %s2545_s4 = sld [smem:[#allocation35_spill]]  ;;  %vm859_vm2 = vcmask 64512   ;;  %v857_v36 = vld [vmem:[%s608_s27] sm:$0xf]  ;;  %v879_v37 = vld [vmem:[%s2326_s0] sm:$0xf] }
 0x1b0   : > { %v858_v38 = vunpack.c.l.bf16 %v857_v36  ;;  %v880_v39 = vunpack.c.l.bf16 %v879_v37  ;;  %vm895_vm3 = vcmask 1043456   ;;  %v929_v53 = vld [vmem:[%s593_s25] sm:$0xf]  ;;  %v927_v6 = vld [vmem:[#allocation5] sm:$0xff]  ;;  %vm950_vm8 = vcmask 261120  }
 0x1b1   : > { %v934_v54 = vsel %vm895_vm3, %v929_v53, 0 }
 0x1b2   : > { %943 = vmatpush.bf16.msra.mxu2 %v934_v54 }
 0x1b5   : > { %s1258_s22 = sshll.u32 %s2545_s4, 2  ;;  %p1264_p7 = scmp.ne.s32.totalorder %s2545_s4, 3 }
 0x1b6   : > { %s852_s17 = scalar_lea.vmem [#allocation3], %s1258_s22  ;;  %s849_s28 = scalar_lea.vmem [#allocation2], %s1258_s22 }
 0x1b7   : > { %v853_v33 = vld [vmem:[%s852_s17] sm:$0xf]  ;;  %s855_s19 = scalar_lea.vmem [#allocation4], %s1258_s22 }
 0x1b8   : > { %v864_v34 = vsel %vm859_vm2, %v853_v33, 0  ;;  %v850_v35 = vld [vmem:[%s849_s28] sm:$0xf] }
 0x1b9   : > { %873 = vmatpush.bf16.xpose.msra.mxu0 %v864_v34  ;;  %v856_v45 = vld [vmem:[%s855_s19] sm:$0xf] }
 0x1ba   : > { %v897_v46 = vsel %vm895_vm3, %v856_v45, 0 }
 0x1bb   : > { %906 = vmatpush.bf16.msra.mxu1 %v897_v46 }
 0x1c0   : > { %1261 = vmatmul.msk.bf16.vlgmr.msra.gmra.mxu0 %vm859_vm2, %v850_v35 }
 0x23d   : > { %v875_v40 = vpop.f32.mrf.mxu0 }
 0x23e   : > { %v876_v41 = vadd.f32 %v875_v40, %v858_v38 }
 0x240   : > { %v881_v42 = vadd.f32 %v880_v39, %v876_v41 }
 0x242   : > { %v882_v43 = vsel %vm859_vm2, %v881_v42, -inf }
 0x243   : > { %883 = vmax.xlane.f32.xlu0 %v882_v43 }
 0x245   : > { %v877_v44 = vpop.f32.mrf.mxu0 }
 0x2b6   : > { %v884_v47 = vpop.xlane.xlu0 %883 }
 0x2b7   : > { %v885_v48 = vsub.f32 %v881_v42, %v884_v47 }
 0x2b9   : > { %v886_v49 = vmul.f32 1.442695, %v885_v48 }
 0x2bb   : > { %1476 = vpow2.f32 %v886_v49 }
 0x2c1   : > { %v1477_v50 = vpop.eup %1476 }
 0x2c2   : > { %v888_v51 = vsel %vm859_vm2, %v1477_v50, 0.0  ;;  %v891_v52 = vpack.c.bf16 %v1477_v50, %v1477_v50 }
 0x2c3   : > { %889 = vadd.xlane.f32.xlu0 %v888_v51 }
 0x2c4   : > { %1262 = vmatmul.msk.bf16.vlgmr.msra.gmra.mxu1 %vm859_vm2, %v891_v52 }
 0x336   : > { %v890_v55 = vpop.xlane.xlu0 %889 }
 0x337   : > { %1478 = vrcp.f32 %v890_v55  ;;  %v923_v59 = vand.u32 2147483648, %v890_v55  ;;  %v921_v62 = vand.u32 2147483647, %v890_v55  ;;  %vm917_vm5 = vweird.f32 %v890_v55 }
 0x339   : > { %v924_v0 = vor.u32 1.1754944e-38, %v923_v59  ;;  %vm922_vm7 = vcmp.eq.f32.partialorder %v921_v62, 8.507059e+37 }
 0x33d   : > { %v1479_v56 = vpop.eup %1478 }
 0x33e   : > { %v913_v57 = vmul.f32 %v1479_v56, %v890_v55  ;;  %vm918_vm4 = vweird.f32 %v1479_v56 }
 0x33f   : > { %vm919_vm6 = vmor %vm917_vm5, %vm918_vm4 }
 0x340   : > { %v914_v58 = vsub.f32 1.0, %v913_v57 }
 0x341   : > { %v908_v60 = vpop.f32.mrf.mxu1 }
 0x342   : > { %v915_v61 = vmul.f32 %v1479_v56, %v914_v58 }
 0x344   : > { %v916_v63 = vadd.f32 %v1479_v56, %v915_v61 }
 0x346   : > { %v920_v1 = vsel %vm919_vm6, %v1479_v56, %v916_v63 }
 0x347   : > { %v925_v2 = vsel %vm922_vm7, %v924_v0, %v920_v1 }
 0x348   : > { %v926_v3 = vmul.f32 %v925_v2, %v908_v60 }
 0x349   : > { %v910_v4 = vpop.f32.mrf.mxu1 }
 0x34a   : > { %v928_v5 = vpack.c.bf16 %v926_v3, %v926_v3 }
 0x34c   : > { %1263 = vmatmul.msk.bf16.vlgmr.msra.gmra.mxu2 %vm859_vm2, %v928_v5 }
 0x3cf   : > { %v945_v7 = vpop.f32.mrf.mxu2 }
 0x3d0   : > { %v949_v8 = vadd.f32 %v945_v7, %v927_v6 }
 0x3d2   : > { %951 = vst.msk [vmem:[#allocation5] sm:$0xff] %vm950_vm8, %v949_v8 }
 0x3d3   : > { %955 = sbr.rel (%p1264_p7) target bundleno = 989 (0x3dd), region = 112 }
 0x3d7   : > { %v947_v9 = vpop.f32.mrf.mxu2 }
 0x3d8   : > { %v1480_v11 = vld [vmem:[#allocation18] ss:$0 sm:$0xff] }
 0x3d9   : > { %v956_v10 = vld [vmem:[#allocation5] sm:$0xff] }
 0x3da   : > { %v961_v12 = vadd.f32 %v1480_v11, %v956_v10 }
 0x3dc   : > { %962 = vst.msk [vmem:[%s2328_s18] sm:$0xff] %vm950_vm8, %v961_v12 }
 0x3dd PF: > { %s2546_s6 = sld [smem:[#allocation36_spill]]  ;;  %s977_s7 = sshll.u32 %s2328_s18, 4  ;;  %s978_s7 = int_to_ptr.vmem [resolvable:$true] %s977_s7 }
 0x3de   : > { %s2548_s8 = sld [smem:[#allocation56_spill]]  ;;  %s964_s12 = scalar_lea.sflag [#allocation8], %s2273_s20 }
 0x3e3   : > { %s1266_s21 = sshll.u32 %s2546_s6, 3 }
 0x3e4   : > { %s975_s5 = scalar_lea.hbm %s2548_s8, %s1266_s21  ;;  %s1771_s4 = scalar_lea.hbm %s2548_s8, 16 }
 0x3e5   : > { %s979_s3 = sshll.u32 %s975_s5, 4  ;;  %s980_s3 = int_to_ptr.hbm [resolvable:$true] %s979_s3 }
 0x3e6   : > { %s1765_s30 = sshra.s32 %s980_s3, 4  ;;  %s1766_s30 = int_to_ptr.hbm [resolvable:$true] %s1765_s30 }
 0x3e7   : > { %s1767_s2 = scalar_lea.hbm %s1766_s30, 8  ;;  %p1772_p9 = scmp.lt.s32.totalorder %s1766_s30, %s2548_s8 }
 0x3e8   : > { %p1768_p12 = scmp.ne.s32.totalorder %s1766_s30, %s1767_s2  ;;  %p1773_p10 = scmp.lt.s32.totalorder %s1771_s4, %s1767_s2 }
 0x3ea   : > { %p1769_p0 = pnand %p1768_p12, %p2120_p13  ;;  %p1774_p11 = por %p1773_p10, %p1772_p9 }
 0x3ec   : > { %p1770_p2 = pneg %p1769_p0 }
 0x3ee   : > { %p1775_p5 = pnand %p1774_p11, %p1770_p2 }
 0x3f0   : > { %1778 = shalt.err (!%p1775_p5)
}
 0x3f1   : > { %1303 = dma.vmem_to_hbm [thread:$0]  (%p2120_p13), %s978_s7, 128, %s980_s3, %s964_s12  }
 0x3f2 PF: > { %s2549_s20 = sld [smem:[#allocation33_spill]]  ;;  %p1349_p6 = scmp.ge.s32.totalorder %s1925_s16, 2 }
 0x3f3   : > { %s2550_s18 = sld [smem:[#allocation41_spill]] }
 0x3f8   : > { %s991_s28 = sand.u32 1, %s2549_s20  }
 0x3f9   : > { %p2551_p4 = scmp.ne.s32.totalorder %s2550_s18, 0  ;;  %s992_s19 = scalar_lea.sflag [#allocation8], %s991_s28 }
 0x3fb   : > { %p1335_p8 = pnand %p1349_p6, %p2551_p4 }
 0x3fd   : > { %p1336_p3 = pneg %p1335_p8 }
 0x3ff   : > { %1868 = dma.done.wait (%p1336_p3), %s992_s19, 128  }
 0x400   : > { %1870 = vsyncadd (%p1336_p3), %s992_s19, 4294967168  ;;  %s33_s16 = sadd.s32 1, %s1925_s16   ;;  %s2553_s21 = sld [smem:[#allocation31_spill]] }
 0x401   : > { %p2390_p1 = scmp.ge.s32.totalorder %s33_s16, 10   ;;  %s2554_s25 = sld [smem:[#allocation32_spill]] }
 0x402   : > { %s2555_s27 = sld [smem:[#allocation34_spill]]  ;;  %s2557_s22 = smov %s1881_s23 }
 0x403   : > { %s2556_s0 = sld [smem:[#allocation42_spill]]  ;;  %s2558_s23 = smov %s2246_s24 }
 0x404   : > { %s2562_s28 = smov %s1905_s29  ;;  %s2563_s29 = smov %s2209_s1 }
 0x405   : > { %s2564_s30 = smov %s1917_s14  ;;  %s2565_s13 = smov %s1921_s15 }
 0x406   : > { %s2567_s15 = smov %s2573_s11  ;;  %32 = sbr.rel (!%p2390_p1) target bundleno = 28 (0x1c), region = 191 }
 0x407   : > { %s2559_s24 = smov %s2554_s25  ;;  %s2560_s25 = smov %s1893_s26 }
 0x408   : > { %s2561_s26 = smov %s2198_s10 }
 0x409   : > { %s2566_s14 = smov %s2556_s0 }
 0x40b   :  { %998 = vsyncpa [#allocation7], 1 }
 0x40c   :  { %1000 = vsyncpa [#allocation7 + $0x1], 1 }
 0x40d   :  { %1001 = vsyncpa [#allocation10], 1 }
 0x40e   :  { %1003 = vsyncpa [#allocation10 + $0x1], 1 }
 0x40f   :  { %1004 = vsyncpa [#allocation13], 1 }
 0x410   :  { %1005 = vsyncpa [#allocation16], 1 }
 0x411   :  { %1006 = vsyncpa [#allocation8], 1 }
 0x412   :  { %1008 = vsyncpa [#allocation8 + $0x1], 1 }

</bundles_post_ra>
